<compile_context>
chip_gen: v7x
topology: tpu7x:2x2x1
jax: 0.10.0
libtpu: 0.0.40
codegen_flags: <defaults>
</compile_context>

<pallas_src>
import math
import functools

import jax
import jax.numpy as jnp
from jax import lax
from jax.experimental import pallas as pl
from jax.experimental.pallas import tpu as pltpu


# ---------------------------------------------------------------------------
# Kernel 1: fused QKV projection   qkv = x @ W_qkv + b_qkv ;  q *= 1/sqrt(hd)
# ---------------------------------------------------------------------------
def _qkv_proj_kernel(x_ref, w_ref, b_ref, q_ref, k_ref, v_ref, *, scale):
    # x_ref: (T, C) f32   w_ref: (C, 3C) bf16   b_ref: (1, 3C) f32
    x = x_ref[...].astype(w_ref.dtype)
    qkv = jnp.dot(x, w_ref[...], preferred_element_type=jnp.float32) + b_ref[...]
    C = q_ref.shape[-1]
    q_ref[...] = (qkv[:, 0 * C:1 * C] * scale).astype(q_ref.dtype)
    k_ref[...] = qkv[:, 1 * C:2 * C].astype(k_ref.dtype)
    v_ref[...] = qkv[:, 2 * C:3 * C].astype(v_ref.dtype)


# ---------------------------------------------------------------------------
# Kernel 2: flash attention over all heads of one (batch, q_tile), kv inner loop
# ---------------------------------------------------------------------------
def _flash_attn_kernel(q_ref, k_ref, v_ref, o_ref, m_sc, l_sc, acc_sc, *, tq, tkv):
    qi = pl.program_id(1)
    ki = pl.program_id(2)

    @pl.when(ki == 0)
    def _init():
        m_sc[...] = jnp.full(m_sc.shape, -jnp.inf, m_sc.dtype)
        l_sc[...] = jnp.zeros(l_sc.shape, l_sc.dtype)
        acc_sc[...] = jnp.zeros(acc_sc.shape, acc_sc.dtype)

    # Skip KV tiles that lie entirely above the causal diagonal.
    @pl.when(ki * tkv <= qi * tq + (tq - 1))
    def _compute():
        q = q_ref[...]                                  # (H, tq,  hd) bf16
        k = k_ref[...]                                  # (H, tkv, hd) bf16
        # K consumed in stored layout (contraction over hd) — no transpose.
        s = jnp.einsum("hqd,hkd->hqk", q, k,
                       preferred_element_type=jnp.float32)  # (H, tq, tkv) f32

        # In-kernel causal predicate (global row >= global col).
        row = qi * tq + lax.broadcasted_iota(jnp.int32, (tq, tkv), 0)
        col = ki * tkv + lax.broadcasted_iota(jnp.int32, (tq, tkv), 1)
        s = jnp.where((row >= col)[None, :, :], s, jnp.float32(-10000000000.0))

        m_prev = m_sc[...]
        m_new = jnp.maximum(m_prev, s.max(axis=-1, keepdims=True))
        alpha = jnp.exp(m_prev - m_new)
        p = jnp.exp(s - m_new)                          # f32 softmax numerator
        l_sc[...] = alpha * l_sc[...] + p.sum(axis=-1, keepdims=True)
        acc_sc[...] = alpha * acc_sc[...] + jnp.einsum(
            "hqk,hkd->hqd", p.astype(v_ref.dtype), v_ref[...],
            preferred_element_type=jnp.float32)
        m_sc[...] = m_new

    @pl.when(ki == pl.num_programs(2) - 1)
    def _finalize():
        inv_l = pl.reciprocal(l_sc[...], approx=True)
        o_ref[...] = (acc_sc[...] * inv_l).astype(o_ref.dtype)


# ---------------------------------------------------------------------------
# Kernel 3: output projection   out = y @ W_proj + b_proj
# ---------------------------------------------------------------------------
def _out_proj_kernel(y_ref, w_ref, b_ref, o_ref):
    y = y_ref[...]                                      # (T, C) bf16
    out = jnp.dot(y, w_ref[...], preferred_element_type=jnp.float32) + b_ref[...]
    o_ref[...] = out.astype(o_ref.dtype)


# ---------------------------------------------------------------------------
# Wrapper
# ---------------------------------------------------------------------------
def causal_self_attention(x, params, n_head, *, q_tile=128, kv_tile=128):
    """x: [B, T, C] float32.  params: dict of [C_in, C_out] weights / (1, C) biases."""
    B, T, C = x.shape
    assert C % n_head == 0
    hd = C // n_head
    scale = 1.0 / math.sqrt(hd)

    tq = min(q_tile, T)
    tkv = min(kv_tile, T)
    assert T % tq == 0 and T % tkv == 0

    compute_dtype = jnp.bfloat16
    vmem_limit = 32 * 1024 * 1024   # explicit scoped-VMEM budget (fits v5e/v6e/v7x)

    # Fused QKV weights (cast once to bf16 — halves weight DMA); biases stay f32.
    w_qkv = jnp.concatenate([params["wq"], params["wk"], params["wv"]],
                            axis=1).astype(compute_dtype)            # (C, 3C)
    b_qkv = jnp.concatenate([params["bq"], params["bk"], params["bv"]],
                            axis=1)                                  # (1, 3C)
    w_p = params["wp"].astype(compute_dtype)                         # (C, C)
    b_p = params["bp"]                                               # (1, C)

    # ---- 1) fused QKV projection -----------------------------------------
    qkv_cost = pl.CostEstimate(
        flops=2 * B * T * C * 3 * C,
        transcendentals=0,
        bytes_accessed=4 * B * T * C + 2 * C * 3 * C + 3 * 2 * B * T * C)

    q, k, v = pl.pallas_call(
        functools.partial(_qkv_proj_kernel, scale=scale),
        out_shape=(jax.ShapeDtypeStruct((B, T, C), compute_dtype),
                   jax.ShapeDtypeStruct((B, T, C), compute_dtype),
                   jax.ShapeDtypeStruct((B, T, C), compute_dtype)),
        grid_spec=pltpu.PrefetchScalarGridSpec(
            num_scalar_prefetch=0,
            grid=(B,),
            in_specs=[
                pl.BlockSpec((None, T, C), lambda b: (b, 0, 0)),      # x
                pl.BlockSpec((C, 3 * C), lambda b: (0, 0)),           # W_qkv
                pl.BlockSpec((1, 3 * C), lambda b: (0, 0)),           # b_qkv
            ],
            out_specs=[
                pl.BlockSpec((None, T, C), lambda b: (b, 0, 0)),      # q (pre-scaled)
                pl.BlockSpec((None, T, C), lambda b: (b, 0, 0)),      # k
                pl.BlockSpec((None, T, C), lambda b: (b, 0, 0)),      # v
            ]),
        compiler_params=pltpu.CompilerParams(
            dimension_semantics=("parallel",),
            vmem_limit_bytes=vmem_limit),
        cost_estimate=qkv_cost,
    )(x, w_qkv, b_qkv)

    # Head-major layout for the attention kernel (wrapper-side layout plumbing).
    q_h = q.reshape(B, T, n_head, hd).transpose(0, 2, 1, 3)   # (B, H, T, hd)
    k_h = k.reshape(B, T, n_head, hd).transpose(0, 2, 1, 3)
    v_h = v.reshape(B, T, n_head, hd).transpose(0, 2, 1, 3)

    # ---- 2) flash attention (online softmax, causal) ----------------------
    nq, nkv = T // tq, T // tkv
    attn_cost = pl.CostEstimate(
        flops=4 * B * n_head * T * T * hd,
        transcendentals=B * n_head * T * T,
        bytes_accessed=4 * 2 * B * T * C)

    y_h = pl.pallas_call(
        functools.partial(_flash_attn_kernel, tq=tq, tkv=tkv),
        out_shape=jax.ShapeDtypeStruct((B, n_head, T, hd), compute_dtype),
        grid_spec=pltpu.PrefetchScalarGridSpec(
            num_scalar_prefetch=0,
            grid=(B, nq, nkv),
            in_specs=[
                pl.BlockSpec((None, n_head, tq, hd),
                             lambda b, qi, ki: (b, 0, qi, 0)),        # q tile
                pl.BlockSpec((None, n_head, tkv, hd),
                             lambda b, qi, ki: (b, 0, ki, 0)),        # k tile
                pl.BlockSpec((None, n_head, tkv, hd),
                             lambda b, qi, ki: (b, 0, ki, 0)),        # v tile
            ],
            out_specs=pl.BlockSpec((None, n_head, tq, hd),
                                   lambda b, qi, ki: (b, 0, qi, 0)),
            scratch_shapes=[
                pltpu.VMEM((n_head, tq, 1), jnp.float32),    # running max
                pltpu.VMEM((n_head, tq, 1), jnp.float32),    # running sum
                pltpu.VMEM((n_head, tq, hd), jnp.float32),   # f32 accumulator
            ]),
        compiler_params=pltpu.CompilerParams(
            dimension_semantics=("parallel", "parallel", "arbitrary"),
            vmem_limit_bytes=vmem_limit),
        cost_estimate=attn_cost,
    )(q_h, k_h, v_h)

    # Back to token-major (B, T, C) for the output projection.
    y = y_h.transpose(0, 2, 1, 3).reshape(B, T, C)

    # ---- 3) output projection ---------------------------------------------
    proj_cost = pl.CostEstimate(
        flops=2 * B * T * C * C,
        transcendentals=0,
        bytes_accessed=2 * B * T * C + 2 * C * C + 4 * B * T * C)

    out = pl.pallas_call(
        _out_proj_kernel,
        out_shape=jax.ShapeDtypeStruct((B, T, C), x.dtype),
        grid_spec=pltpu.PrefetchScalarGridSpec(
            num_scalar_prefetch=0,
            grid=(B,),
            in_specs=[
                pl.BlockSpec((None, T, C), lambda b: (b, 0, 0)),      # y
                pl.BlockSpec((C, C), lambda b: (0, 0)),               # W_proj
                pl.BlockSpec((1, C), lambda b: (0, 0)),               # b_proj
            ],
            out_specs=pl.BlockSpec((None, T, C), lambda b: (b, 0, 0)),
        ),
        compiler_params=pltpu.CompilerParams(
            dimension_semantics=("parallel",),
            vmem_limit_bytes=vmem_limit),
        cost_estimate=proj_cost,
    )(y, w_p, b_p)

    return out


# ---------------------------------------------------------------------------
# Pure-JAX reference (mirrors the PyTorch forward in eval mode, all f32)
# ---------------------------------------------------------------------------
def _reference(x, params, n_head):
    B, T, C = x.shape
    hd = C // n_head
    q = x @ params["wq"] + params["bq"][0]
    k = x @ params["wk"] + params["bk"][0]
    v = x @ params["wv"] + params["bv"][0]
    q = q.reshape(B, T, n_head, hd).transpose(0, 2, 1, 3)
    k = k.reshape(B, T, n_head, hd).transpose(0, 2, 1, 3)
    v = v.reshape(B, T, n_head, hd).transpose(0, 2, 1, 3)
    att = jnp.einsum("bhtd,bhsd->bhts", q, k) * (1.0 / math.sqrt(hd))
    mask = jnp.tril(jnp.ones((T, T)))
    att = jnp.where(mask == 0, -10000000000.0, att)
    att = jax.nn.softmax(att, axis=-1)
    y = jnp.einsum("bhts,bhsd->bhtd", att, v)
    y = y.transpose(0, 2, 1, 3).reshape(B, T, C)
    return y @ params["wp"] + params["bp"][0]


if __name__ == "__main__":
    # Small config: batch=2, seq=8, n_embd=32, n_head=4 (head_dim=8).
    B, T, C, n_head = 2, 8, 32, 4

    key = jax.random.PRNGKey(0)
    ks = jax.random.split(key, 9)
    std = 0.02
    params = {
        # weights stored as [C_in, C_out] (already transposed vs. nn.Linear)
        "wq": std * jax.random.normal(ks[0], (C, C), jnp.float32),
        "bq": std * jax.random.normal(ks[1], (1, C), jnp.float32),
        "wk": std * jax.random.normal(ks[2], (C, C), jnp.float32),
        "bk": std * jax.random.normal(ks[3], (1, C), jnp.float32),
        "wv": std * jax.random.normal(ks[4], (C, C), jnp.float32),
        "bv": std * jax.random.normal(ks[5], (1, C), jnp.float32),
        "wp": std * jax.random.normal(ks[6], (C, C), jnp.float32),
        "bp": std * jax.random.normal(ks[7], (1, C), jnp.float32),
    }
    x = jax.random.normal(ks[8], (B, T, C), jnp.float32)

    y = causal_self_attention(x, params, n_head)
    y = jax.block_until_ready(y)

    y_ref = _reference(x, params, n_head)
    assert y.shape == (B, T, C)
    # bf16 MXU operands + approximate reciprocal -> loosened tolerance vs. the
    # pure-f32 reference (errors measured well inside these bounds).
    assert jnp.allclose(y, y_ref, atol=2e-3, rtol=2e-2), (
        f"max abs err = {float(jnp.max(jnp.abs(y - y_ref)))}")

    print("KERNEL_OK")
</pallas_src>

<mosaic_0001>
module attributes {stable_mosaic.version = 11 : i64} {
  func.func @_qkv_proj_kernel(%arg0: i32, %arg1: memref<1x8x32xf32, #tpu.memory_space<vmem>>, %arg2: memref<32x96xbf16, #tpu.memory_space<vmem>>, %arg3: memref<1x96xf32, #tpu.memory_space<vmem>>, %arg4: memref<1x8x32xbf16, #tpu.memory_space<vmem>>, %arg5: memref<1x8x32xbf16, #tpu.memory_space<vmem>>, %arg6: memref<1x8x32xbf16, #tpu.memory_space<vmem>>) attributes {dimension_semantics = [#tpu.dimension_semantics<parallel>], iteration_bounds = array<i64: 2>, scalar_prefetch = 0 : i64, scratch_operands = 0 : i64, tpu.core_type = #tpu.core_type<tc>, window_params = [{transform_indices = @transform_0, window_bounds = array<i64: 1, 8, 32>}, {pipeline_mode = #tpu.pipeline_mode<synchronous>, transform_indices = @transform_1, window_bounds = array<i64: 32, 96>}, {pipeline_mode = #tpu.pipeline_mode<synchronous>, transform_indices = @transform_2, window_bounds = array<i64: 1, 96>}, {transform_indices = @transform_3, window_bounds = array<i64: 1, 8, 32>}, {transform_indices = @transform_4, window_bounds = array<i64: 1, 8, 32>}, {transform_indices = @transform_5, window_bounds = array<i64: 1, 8, 32>}]} {
    %c0 = arith.constant 0 : index
    %c0_0 = arith.constant 0 : index
    %c0_1 = arith.constant 0 : index
    %0 = vector.load %arg1[%c0, %c0_0, %c0_1] : memref<1x8x32xf32, #tpu.memory_space<vmem>>, vector<1x8x32xf32>
    %1 = vector.shape_cast %0 : vector<1x8x32xf32> to vector<8x32xf32>
    %2 = arith.truncf %1 : vector<8x32xf32> to vector<8x32xbf16>
    %c0_2 = arith.constant 0 : index
    %c0_3 = arith.constant 0 : index
    %3 = vector.load %arg2[%c0_2, %c0_3] : memref<32x96xbf16, #tpu.memory_space<vmem>>, vector<32x96xbf16>
    %cst = arith.constant dense<0.000000e+00> : vector<8x96xf32>
    %4 = tpu.matmul %2, %3, %cst {dimension_numbers = #tpu.dot_dimension_numbers<[1], [0], [0], [1], [0, 0, 1, 1], [], []>} : vector<8x32xbf16>, vector<32x96xbf16>, vector<8x96xf32> -> vector<8x96xf32>
    %c0_4 = arith.constant 0 : index
    %c0_5 = arith.constant 0 : index
    %5 = vector.load %arg3[%c0_4, %c0_5] : memref<1x96xf32, #tpu.memory_space<vmem>>, vector<1x96xf32>
    %6 = vector.broadcast %5 : vector<1x96xf32> to vector<8x96xf32>
    %7 = arith.addf %4, %6 : vector<8x96xf32>
    %8 = vector.extract_strided_slice %7 {offsets = [0, 0], sizes = [8, 32], strides = [1, 1]} : vector<8x96xf32> to vector<8x32xf32>
    %cst_6 = arith.constant 0.353553385 : f32
    %9 = vector.broadcast %cst_6 : f32 to vector<8x32xf32>
    %10 = arith.mulf %8, %9 : vector<8x32xf32>
    %11 = arith.truncf %10 : vector<8x32xf32> to vector<8x32xbf16>
    %c0_7 = arith.constant 0 : index
    %c0_8 = arith.constant 0 : index
    %c0_9 = arith.constant 0 : index
    %12 = vector.load %arg4[%c0_7, %c0_8, %c0_9] : memref<1x8x32xbf16, #tpu.memory_space<vmem>>, vector<1x8x32xbf16>
    %13 = vector.shape_cast %12 : vector<1x8x32xbf16> to vector<8x32xbf16>
    %14 = vector.shape_cast %11 : vector<8x32xbf16> to vector<1x8x32xbf16>
    tpu.vector_store %arg4[%c0_7, %c0_8, %c0_9], %14 {strides = array<i32>} : memref<1x8x32xbf16, #tpu.memory_space<vmem>>, vector<1x8x32xbf16>,
    %15 = vector.extract_strided_slice %7 {offsets = [0, 32], sizes = [8, 32], strides = [1, 1]} : vector<8x96xf32> to vector<8x32xf32>
    %16 = arith.truncf %15 : vector<8x32xf32> to vector<8x32xbf16>
    %c0_10 = arith.constant 0 : index
    %c0_11 = arith.constant 0 : index
    %c0_12 = arith.constant 0 : index
    %17 = vector.load %arg5[%c0_10, %c0_11, %c0_12] : memref<1x8x32xbf16, #tpu.memory_space<vmem>>, vector<1x8x32xbf16>
    %18 = vector.shape_cast %17 : vector<1x8x32xbf16> to vector<8x32xbf16>
    %19 = vector.shape_cast %16 : vector<8x32xbf16> to vector<1x8x32xbf16>
    tpu.vector_store %arg5[%c0_10, %c0_11, %c0_12], %19 {strides = array<i32>} : memref<1x8x32xbf16, #tpu.memory_space<vmem>>, vector<1x8x32xbf16>,
    %20 = vector.extract_strided_slice %7 {offsets = [0, 64], sizes = [8, 32], strides = [1, 1]} : vector<8x96xf32> to vector<8x32xf32>
    %21 = arith.truncf %20 : vector<8x32xf32> to vector<8x32xbf16>
    %c0_13 = arith.constant 0 : index
    %c0_14 = arith.constant 0 : index
    %c0_15 = arith.constant 0 : index
    %22 = vector.load %arg6[%c0_13, %c0_14, %c0_15] : memref<1x8x32xbf16, #tpu.memory_space<vmem>>, vector<1x8x32xbf16>
    %23 = vector.shape_cast %22 : vector<1x8x32xbf16> to vector<8x32xbf16>
    %24 = vector.shape_cast %21 : vector<8x32xbf16> to vector<1x8x32xbf16>
    tpu.vector_store %arg6[%c0_13, %c0_14, %c0_15], %24 {strides = array<i32>} : memref<1x8x32xbf16, #tpu.memory_space<vmem>>, vector<1x8x32xbf16>,
    return
  }
  func.func @transform_0(%arg0: i32) -> (i32, i32, i32) {
    %c0_i32 = arith.constant 0 : i32
    %c0_i32_0 = arith.constant 0 : i32
    %c0_i32_1 = arith.constant 0 : i32
    return %arg0, %c0_i32, %c0_i32_0 : i32, i32, i32
  }
  func.func @transform_1(%arg0: i32) -> (i32, i32) {
    %c0_i32 = arith.constant 0 : i32
    %c0_i32_0 = arith.constant 0 : i32
    %c0_i32_1 = arith.constant 0 : i32
    return %c0_i32, %c0_i32_0 : i32, i32
  }
  func.func @transform_2(%arg0: i32) -> (i32, i32) {
    %c0_i32 = arith.constant 0 : i32
    %c0_i32_0 = arith.constant 0 : i32
    %c0_i32_1 = arith.constant 0 : i32
    return %c0_i32, %c0_i32_0 : i32, i32
  }
  func.func @transform_3(%arg0: i32) -> (i32, i32, i32) {
    %c0_i32 = arith.constant 0 : i32
    %c0_i32_0 = arith.constant 0 : i32
    %c0_i32_1 = arith.constant 0 : i32
    return %arg0, %c0_i32, %c0_i32_0 : i32, i32, i32
  }
  func.func @transform_4(%arg0: i32) -> (i32, i32, i32) {
    %c0_i32 = arith.constant 0 : i32
    %c0_i32_0 = arith.constant 0 : i32
    %c0_i32_1 = arith.constant 0 : i32
    return %arg0, %c0_i32, %c0_i32_0 : i32, i32, i32
  }
  func.func @transform_5(%arg0: i32) -> (i32, i32, i32) {
    %c0_i32 = arith.constant 0 : i32
    %c0_i32_0 = arith.constant 0 : i32
    %c0_i32_1 = arith.constant 0 : i32
    return %arg0, %c0_i32, %c0_i32_0 : i32, i32, i32
  }
}

</mosaic_0001>

<bundles_post_ra>
// kernel: tpu_custom_call.1
= control target key start
LH: loop header
LB: loop body
LE: loop exit
PB: predicated region body
PF: predicated region fallthrough
CT: control target
= control target key end

     0   :  { %11 = vsyncpa [#allocation3], 0  ;;  %s1178_s0 = inlined_call_operand.hbm [shape: f32[2,8,32], index: 0, kind: input, shape index: {}]   ;;  %s1179_s1 = inlined_call_operand.hbm [shape: bf16[32,96], index: 1, kind: input, shape index: {}]   ;;  %s1180_s2 = inlined_call_operand.vmem [shape: f32[1,96], index: 2, kind: input, shape index: {}]   ;;  %s1181_s3 = inlined_call_operand.hbm [shape: bf16[2,8,32], index: 3, kind: output, shape index: {0}]   ;;  %s1182_s4 = inlined_call_operand.hbm [shape: bf16[2,8,32], index: 4, kind: output, shape index: {1}]   ;;  %s1183_s5 = inlined_call_operand.hbm [shape: bf16[2,8,32], index: 5, kind: output, shape index: {2}]  }
   0x1   :  { %13 = vsyncpa [#allocation3 + $0x1], 0 }
   0x2   :  { %14 = vsyncpa [#allocation6], 0 }
   0x3   :  { %15 = vsyncpa [#allocation4], 0 }
   0x4   :  { %17 = vsyncpa [#allocation4 + $0x1], 0 }
   0x5   :  { %18 = vsyncpa [#allocation9], 0 }
   0x6   :  { %20 = vsyncpa [#allocation9 + $0x1], 0  ;;  %s893_s18 = smov 0   ;;  %s895_s19 = smov 0  }
   0x7   :  { %s897_s20 = smov 0   ;;  %s899_s21 = smov 0  }
   0x8 LB: > { %s914_s22 = sadd.s32 4294967295, %s850_s21   ;;  %s550_s23 = sadd.s32 4294967294, %s850_s21   ;;  %s850_s21 = sphi %s899_s21, %s1203_s21   ;;  %s846_s20 = sphi %s897_s20, %s1202_s20   ;;  %s842_s19 = sphi %s895_s19, %s1201_s19   ;;  %s838_s18 = sphi %s893_s18, %s1200_s18  }
   0x9   : > { %p46_p0 = scmp.ne.s32.totalorder %s842_s19, %s838_s18  ;;  %p1184_p1 = scmp.eq.s32.totalorder %s914_s22, 0 }
   0xa   : > { %p118_p3 = scmp.eq.s32.totalorder %s550_s23, 1  ;;  %p551_p5 = scmp.ge.s32.totalorder %s850_s21, 1 }
   0xb   : > { %p925_p4 = por %p1184_p1, %p46_p0  ;;  %p177_p7 = scmp.lt.s32.totalorder %s850_s21, 3 }
   0xc   : > { %p930_p6 = por %p118_p3, %p46_p0  ;;  %s852_s27 = smov [#allocation5]  }
   0xd   : > { %s1187_s24 = scalar_select %p925_p4, 1, 0 }
   0xe   : > { %s1188_s25 = scalar_select %p930_p6, 1, 0 }
   0xf   : > { %p935_p8 = pnand %p551_p5, %p177_p7  ;;  %s189_s28 = sshll.u32 %s852_s27, 4  ;;  %s939_s28 = int_to_ptr.vmem [resolvable:$true] %s189_s28 }
  0x10   : > { %s951_s30 = sadd.s32 1, %s850_s21   ;;  %s33_s6 = sadd.s32 1, %s846_s20 }
  0x11   : > { %s1189_s26 = scalar_select %p935_p8, 1, 0 }
  0x12   : > { %p599_p9 = pneg %p935_p8  ;;  %s30_s7 = ssub.s32 %s850_s21, %s951_s30 }
  0x13   : > { %s662_s10 = scalar_lea.hbm %s1179_s1, 256 }
  0x14   : > { %p946_p11 = pnand %p599_p9, %p1184_p1  ;;  %p663_p12 = scmp.ne.s32.totalorder %s1179_s1, %s662_s10 }
  0x15   : > { %p669_p5 = scmp.lt.u32.totalorder %s662_s10, %s1179_s1 }
  0x16   : > { %p664_p13 = pneg %p946_p11 }
  0x18   : > { %p665_p0 = pnand %p664_p13, %p663_p12 }
  0x1a   : > { %p666_p3 = pneg %p665_p0 }
  0x1c   : > { %p671_p7 = pnand %p669_p5, %p666_p3 }
  0x1e   : > { %674 = shalt.err (!%p671_p7)
}
  0x1f   : > { %s675_s15 = scalar_lea.vmem %s939_s28, 256  ;;  %p683_p2 = scmp.lt.s32.totalorder %s939_s28, %s939_s28 }
  0x20   : > { %p676_p9 = scmp.ne.s32.totalorder %s939_s28, %s675_s15  ;;  %p684_p6 = scmp.lt.s32.totalorder %s675_s15, %s675_s15 }
  0x22   : > { %p678_p10 = pnand %p676_p9, %p664_p13  ;;  %p685_p4 = por %p684_p6, %p683_p2 }
  0x24   : > { %p679_p1 = pneg %p678_p10 }
  0x26   : > { %p686_p8 = pnand %p685_p4, %p679_p1 }
  0x28   : > { %689 = shalt.err (!%p686_p8)
}
  0x29   : > { %s853_s16 = smov 64   ;;  %s854_s17 = smov 4  }
  0x2a   : > { %602 = dma.hbm_to_vmem [thread:$0]  (!%p946_p11), %s1179_s1, 256, %s939_s28, [#allocation6], %s853_s16, %s853_s16, %s854_s17  }
  0x2b   : > { %p31_p2 = scmp.eq.s32.totalorder %s30_s7, 0  ;;  %p40_p1 = scmp.ne.s32.totalorder %s846_s20, %s842_s19 }
  0x2c   : > { %p41_p4 = scmp.eq.s32.totalorder %s850_s21, 0  ;;  %p618_p6 = scmp.lt.s32.totalorder %s850_s21, 2 }
  0x2d   : > { %s982_s9 = scalar_select %p31_p2, %s846_s20, %s33_s6  }
  0x2e   : > { %p42_p8 = por %p41_p4, %p40_p1  ;;  %p1191_p10 = scmp.eq.s32.totalorder %s914_s22, 1 }
  0x2f   : > { %s206_s11 = sand.u32 1, %s846_s20   ;;  %s555_s12 = sshll.u32 %s850_s21, 7 }
  0x30   : > { %p986_p12 = por %p1191_p10, %p40_p1  ;;  %s554_s13 = sshll.u32 %s206_s11, 3 }
  0x31   : > { %s995_s15 = scalar_lea.hbm %s1178_s0, %s555_s12  ;;  %s210_s28 = scalar_lea.vmem [#allocation2], %s554_s13 }
  0x32   : > { %s217_s6 = sshll.u32 %s210_s28, 4  ;;  %p997_p11 = pnand %p618_p6, %p42_p8  ;;  %s1001_s6 = int_to_ptr.vmem [resolvable:$true] %s217_s6 }
  0x33   : > { %s207_s16 = scalar_lea.sflag [#allocation3], %s206_s11  ;;  %s690_s17 = scalar_lea.hbm %s995_s15, 128 }
  0x34   : > { %p691_p13 = scmp.ne.s32.totalorder %s995_s15, %s690_s17  ;;  %p692_p0 = pneg %p997_p11 }
  0x35   : > { %s695_s12 = scalar_lea.hbm %s1178_s0, 256  ;;  %p696_p7 = scmp.lt.u32.totalorder %s995_s15, %s1178_s0 }
  0x36   : > { %p693_p3 = pnand %p692_p0, %p691_p13  ;;  %p697_p9 = scmp.lt.u32.totalorder %s695_s12, %s690_s17 }
  0x37   : > { %p699_p1 = scmp.lt.u32.totalorder %s690_s17, %s995_s15 }
  0x38   : > { %p694_p5 = pneg %p693_p3  ;;  %p698_p2 = por %p697_p9, %p696_p7 }
  0x3a   : > { %p700_p4 = por %p699_p1, %p698_p2 }
  0x3c   : > { %p701_p6 = pnand %p700_p4, %p694_p5 }
  0x3e   : > { %704 = shalt.err (!%p701_p6)
}
  0x3f   : > { %s705_s11 = scalar_lea.vmem %s1001_s6, 128  ;;  %s855_s14 = smov [#allocation2]  }
  0x40   : > { %p706_p8 = scmp.ne.s32.totalorder %s1001_s6, %s705_s11  ;;  %s710_s28 = sshll.u32 %s855_s14, 4  ;;  %s711_s28 = int_to_ptr.vmem [resolvable:$false] %s710_s28 }
  0x41   : > { %s712_s27 = scalar_lea.vmem %s711_s28, 256  ;;  %p713_p3 = scmp.lt.s32.totalorder %s1001_s6, %s711_s28 }
  0x42   : > { %p708_p10 = pnand %p706_p8, %p692_p0  ;;  %p714_p7 = scmp.lt.s32.totalorder %s712_s27, %s705_s11 }
  0x44   : > { %p709_p13 = pneg %p708_p10  ;;  %p715_p9 = por %p714_p7, %p713_p3 }
  0x46   : > { %p716_p2 = pnand %p715_p9, %p709_p13 }
  0x48   : > { %719 = shalt.err (!%p716_p2)
}
  0x49   : > { %606 = dma.hbm_to_vmem [thread:$0]  (!%p997_p11), %s995_s15, 128, %s1001_s6, %s207_s16  }
  0x4a   : > { %p1194_p5 = scmp.ne.s32.totalorder %s1189_s26, 0 }
  0x4b   : > { %s1031_s17 = sand.u32 (!%p1194_p5), 1, %s842_s19   ;;  %p1195_p0 = scmp.ne.s32.totalorder (!%p1194_p5), %s1187_s24, 0 }
  0x4c   : > { %226 = sbr.rel (%p1194_p5) target bundleno = 464 (0x1d0), region = 32  ;;  %s557_s8 = sshll.u32 (!%p1194_p5), %s1031_s17, 3 }
  0x4d   : > { %s229_s12 = scalar_lea.sflag (!%p1194_p5), [#allocation3], %s1031_s17  ;;  %s232_s13 = scalar_lea.vmem (!%p1194_p5), [#allocation2], %s557_s8 }
  0x53   : > { %821 = dma.done.wait (%p1195_p0), %s229_s12, 128  }
  0x54   : > { %823 = vsyncadd (%p1195_p0), %s229_s12, 4294967168  ;;  %p1196_p1 = scmp.eq.s32.totalorder %s914_s22, 0 }
  0x56   : > { %825 = dma.done.wait (%p1196_p1), [#allocation6], 256   ;;  %p1197_p11 = pmov %p1196_p1 }
  0x57   : > { %v856_v0 = vmov 0.0   ;;  %vm857_vm0 = vmmov 0   ;;  %v660_v1 = vld [vmem:[#allocation5] sm:$0xff]   ;;  %v661_v2 = vld [vmem:[#allocation5 + $0x8] sm:$0xff]   ;;  %v274_v3 = vld [vmem:[%s232_s13] sm:$0xff]  ;;  %vm299_vm1 = vcmask 261120  }
  0x58   : > { %827 = vsyncadd (%p1197_p11), [#allocation6], 4294967040  ;;  %579 = vmatprep.subr.bf16.mxu0 %v856_v0  ;;  %583 = vmatprep.mubr.msk.bf16.mxu0 %vm857_vm0, %v856_v0  ;;  %v275_v4 = vpack.c.bf16 %v274_v3, %v274_v3  ;;  %v562_v5 = vld [vmem:[%s1180_s2] ss:$0 sm:$0xff]  ;;  %s1047_s15 = sshll.u32 %s1031_s17, 2  ;;  %s1050_s6 = sshll.u32 %s914_s22, 6 }
  0x59   : > { %580 = vmatpush3.bf16.msra.mxu0 %v660_v1  ;;  %s258_s7 = scalar_lea.vmem [#allocation7], %s1047_s15  ;;  %vm345_vm2 = vcmask 257024   ;;  %s858_s29 = smov 96  }
  0x5a   : > { %581 = vmatprep.subr.bf16.mxu0 %v856_v0  ;;  %s383_s16 = sshll.u32 %s258_s7, 4  ;;  %s1057_s28 = scalar_lea.hbm %s1181_s3, %s1050_s6  ;;  %s1059_s16 = int_to_ptr.vmem [resolvable:$true] %s383_s16 }
  0x5b   : > { %s360_s27 = scalar_lea.sflag [#allocation4], %s1031_s17  ;;  %s720_s8 = scalar_lea.vmem %s1059_s16, 64 }
  0x5c   : > { %p721_p4 = scmp.ne.s32.totalorder %s1059_s16, %s720_s8  ;;  %s859_s12 = smov [#allocation7]  }
  0x5d   : > { %582 = vmatpush3.bf16.msra.mxu0 %v661_v2  ;;  %s724_s13 = sshll.u32 %s859_s12, 4  ;;  %s725_s13 = int_to_ptr.vmem [resolvable:$false] %s724_s13 }
  0x5e   : > { %p722_p6 = pnand %p721_p4, %p986_p12  ;;  %s726_s24 = scalar_lea.vmem %s725_s13, 128 }
  0x5f   : > { %p727_p10 = scmp.lt.s32.totalorder %s1059_s16, %s725_s13  ;;  %p728_p13 = scmp.lt.s32.totalorder %s726_s24, %s720_s8 }
  0x60   : > { %584 = vmatmul.mubr.msk.bf16.vlgmr.msra.gmra.mrb[0].mxu0 %vm299_vm1, %v275_v4  ;;  %p723_p8 = pneg %p722_p6 }
  0x61   : > { %p729_p3 = por %p728_p13, %p727_p10 }
  0x63   : > { %p730_p7 = pnand %p729_p3, %p723_p8 }
 0x133   : > { %v337_v6 = vpop.f32.mrb[0].mxu0 }
 0x134   : > { %v338_v7 = vadd.f32 %v562_v5, %v337_v6  ;;  %v585_v8 = vpop.f32.mrb[1].mxu0 }
 0x135   : > { %v340_v9 = vpop.f32.mrb[2].mxu0 }
 0x136   : > { %v343_v10 = vmul.f32 0.35355338, %v338_v7  ;;  %v586_v11 = vpop.f32.mrb[3].mxu0  ;;  %v575_v12 = vpack.c.bf16 %v338_v7, %v338_v7 }
 0x138   : > { %v344_v13 = vpack.c.bf16 %v343_v10, %v343_v10  ;;  %351 = vrot.lane.b32.xlu0 %v575_v12, %s858_s29 }
 0x13a   : > { %346 = vst.msk [vmem:[%s258_s7] sm:$0xf] %vm345_vm2, %v344_v13 }
 0x13b   : > { %733 = shalt.err (!%p730_p7)
}
 0x13c   : > { %s734_s17 = scalar_lea.hbm %s1057_s28, 64  ;;  %s738_s29 = scalar_lea.hbm %s1181_s3, 128 }
 0x13d   : > { %p735_p9 = scmp.ne.s32.totalorder %s1057_s28, %s734_s17  ;;  %p739_p0 = scmp.lt.u32.totalorder %s1057_s28, %s1181_s3 }
 0x13e   : > { %p740_p1 = scmp.lt.u32.totalorder %s738_s29, %s734_s17  ;;  %p742_p4 = scmp.lt.u32.totalorder %s734_s17, %s1057_s28 }
 0x13f   : > { %p736_p2 = pnand %p735_p9, %p986_p12 }
 0x140   : > { %p741_p11 = por %p740_p1, %p739_p0 }
 0x141   : > { %p737_p5 = pneg %p736_p2 }
 0x142   : > { %p743_p6 = por %p742_p4, %p741_p11 }
 0x144   : > { %p744_p8 = pnand %p743_p6, %p737_p5 }
 0x146   : > { %747 = shalt.err (!%p744_p8)
}
 0x147   : > { %593 = dma.vmem_to_hbm [thread:$0]  (%p986_p12), %s1059_s16, 64, %s1057_s28, %s360_s27  }
 0x148   : > { %s860_s8 = smov 64   ;;  %s364_s12 = sand.u32 1, %s914_s22  }
 0x149   : > { %355 = vrot.lane.b32.xlu0 %v575_v12, %s860_s8  ;;  %s265_s13 = scalar_lea.vmem [#allocation8], %s1047_s15  ;;  %s1090_s7 = scalar_lea.hbm %s1182_s4, %s1050_s6 }
 0x14a   : > { %s396_s24 = sshll.u32 %s265_s13, 4  ;;  %s272_s29 = scalar_lea.vmem [#allocation10], %s1047_s15  ;;  %s1092_s24 = int_to_ptr.vmem [resolvable:$true] %s396_s24 }
 0x14b   : > { %s1097_s11 = sshll.u32 %s272_s29, 4  ;;  %s1100_s22 = scalar_lea.sflag [#allocation9], %s364_s12  ;;  %s1131_s11 = int_to_ptr.vmem [resolvable:$true] %s1097_s11 }
 0x14c   : > { %s748_s16 = scalar_lea.vmem %s1092_s24, 64  ;;  %s861_s28 = smov [#allocation8]  }
 0x14d   : > { %p749_p10 = scmp.ne.s32.totalorder %s1092_s24, %s748_s16  ;;  %s752_s27 = sshll.u32 %s861_s28, 4  ;;  %s753_s27 = int_to_ptr.vmem [resolvable:$false] %s752_s27 }
 0x14e   : > { %s754_s14 = scalar_lea.vmem %s753_s27, 128  ;;  %p755_p7 = scmp.lt.s32.totalorder %s1092_s24, %s753_s27 }
 0x14f   : > { %p750_p13 = pnand %p749_p10, %p986_p12  ;;  %p756_p9 = scmp.lt.s32.totalorder %s754_s14, %s748_s16 }
 0x151   : > { %p751_p3 = pneg %p750_p13  ;;  %p757_p2 = por %p756_p9, %p755_p7 }
 0x153   : > { %p758_p5 = pnand %p757_p2, %p751_p3 }
 0x1aa   : > { %v352_v14 = vpop.permute.xlu0 %351 }
 0x1ab   : > { %354 = vst.msk [vmem:[%s265_s13] sm:$0xf] %vm345_vm2, %v352_v14 }
 0x1ac   : > { %761 = shalt.err (!%p758_p5)
}
 0x1ad   : > { %s762_s8 = scalar_lea.hbm %s1090_s7, 64  ;;  %s766_s17 = scalar_lea.hbm %s1182_s4, 128 }
 0x1ae   : > { %p763_p0 = scmp.ne.s32.totalorder %s1090_s7, %s762_s8  ;;  %p767_p4 = scmp.lt.u32.totalorder %s1090_s7, %s1182_s4 }
 0x1af   : > { %p768_p6 = scmp.lt.u32.totalorder %s766_s17, %s762_s8  ;;  %p770_p10 = scmp.lt.u32.totalorder %s762_s8, %s1090_s7 }
 0x1b0   : > { %p764_p1 = pnand %p763_p0, %p986_p12 }
 0x1b1   : > { %p769_p8 = por %p768_p6, %p767_p4 }
 0x1b2   : > { %p765_p11 = pneg %p764_p1 }
 0x1b3   : > { %p771_p13 = por %p770_p10, %p769_p8 }
 0x1b5   : > { %p772_p3 = pnand %p771_p13, %p765_p11 }
 0x1b7   : > { %775 = shalt.err (!%p772_p3)
}
 0x1b8   : > { %594 = dma.vmem_to_hbm [thread:$0]  (%p986_p12), %s1092_s24, 64, %s1090_s7, %s1100_s22  }
 0x1b9   : > { %s1128_s14 = scalar_lea.hbm %s1183_s5, %s1050_s6  ;;  %s776_s8 = scalar_lea.vmem %s1131_s11, 64 }
 0x1ba   : > { %p777_p7 = scmp.ne.s32.totalorder %s1131_s11, %s776_s8  ;;  %s862_s24 = smov [#allocation10]  }
 0x1bb   : > { %v356_v15 = vpop.permute.xlu0 %355  ;;  %s780_s7 = sshll.u32 %s862_s24, 4  ;;  %s781_s7 = int_to_ptr.vmem [resolvable:$false] %s780_s7 }
 0x1bc   : > { %358 = vst.msk [vmem:[%s272_s29] sm:$0xf] %vm345_vm2, %v356_v15  ;;  %p778_p9 = pnand %p777_p7, %p986_p12  ;;  %s782_s12 = scalar_lea.vmem %s781_s7, 128 }
 0x1bd   : > { %p783_p5 = scmp.lt.s32.totalorder %s1131_s11, %s781_s7  ;;  %p784_p0 = scmp.lt.s32.totalorder %s782_s12, %s776_s8 }
 0x1be   : > { %p779_p2 = pneg %p778_p9 }
 0x1bf   : > { %p785_p1 = por %p784_p0, %p783_p5 }
 0x1c1   : > { %p786_p11 = pnand %p785_p1, %p779_p2 }
 0x1c3   : > { %789 = shalt.err (!%p786_p11)
}
 0x1c4   : > { %s790_s15 = scalar_lea.hbm %s1128_s14, 64  ;;  %s794_s13 = scalar_lea.hbm %s1183_s5, 128 }
 0x1c5   : > { %p791_p4 = scmp.ne.s32.totalorder %s1128_s14, %s790_s15  ;;  %p795_p10 = scmp.lt.u32.totalorder %s1128_s14, %s1183_s5 }
 0x1c6   : > { %p796_p13 = scmp.lt.u32.totalorder %s794_s13, %s790_s15  ;;  %p798_p7 = scmp.lt.u32.totalorder %s790_s15, %s1128_s14 }
 0x1c7   : > { %p792_p6 = pnand %p791_p4, %p986_p12 }
 0x1c8   : > { %p797_p3 = por %p796_p13, %p795_p10 }
 0x1c9   : > { %p793_p8 = pneg %p792_p6 }
 0x1ca   : > { %p799_p9 = por %p798_p7, %p797_p3 }
 0x1cc   : > { %p800_p2 = pnand %p799_p9, %p793_p8 }
 0x1ce   : > { %803 = shalt.err (!%p800_p2)
}
 0x1cf   : > { %595 = dma.vmem_to_hbm [thread:$0]  (%p986_p12), %s1131_s11, 64, %s1128_s14, %s1100_s22  }
 0x1d0 PF: > { %s421_s28 = sand.u32 1, %s838_s18   ;;  %p1198_p5 = scmp.ne.s32.totalorder %s1188_s25, 0 }
 0x1d1   : > { %p1199_p0 = scmp.ge.s32.totalorder %s850_s21, 2  ;;  %s422_s16 = scalar_lea.sflag [#allocation4], %s421_s28 }
 0x1d3   : > { %p608_p1 = pnand %p1199_p0, %p1198_p5 }
 0x1d5   : > { %829 = dma.done.wait (!%p608_p1), %s422_s16, 64  }
 0x1d6   : > { %831 = vsyncadd (!%p608_p1), %s422_s16, 4294967232  ;;  %s430_s27 = sand.u32 1, %s550_s23  }
 0x1d7   : > { %s431_s8 = scalar_lea.sflag [#allocation9], %s430_s27 }
 0x1d8   : > { %833 = dma.done.wait (!%p608_p1), %s431_s8, 128  }
 0x1d9   : > { %835 = vsyncadd (!%p608_p1), %s431_s8, 4294967168  ;;  %p23_p12 = scmp.ge.s32.totalorder %s951_s30, 4   ;;  %s1200_s18 = smov %s842_s19 }
 0x1da   : > { %s1201_s19 = smov %s846_s20  ;;  %s1202_s20 = smov %s982_s9 }
 0x1db   : > { %s1203_s21 = smov %s951_s30  ;;  %25 = sbr.rel (!%p23_p12) target bundleno = 8 (0x8), region = 113 }
 0x1e2   :  { %445 = vsyncpa [#allocation3], 1 }
 0x1e3   :  { %447 = vsyncpa [#allocation3 + $0x1], 1 }
 0x1e4   :  { %448 = vsyncpa [#allocation6], 1 }
 0x1e5   :  { %449 = vsyncpa [#allocation4], 1 }
 0x1e6   :  { %451 = vsyncpa [#allocation4 + $0x1], 1 }
 0x1e7   :  { %452 = vsyncpa [#allocation9], 1 }
 0x1e8   :  { %454 = vsyncpa [#allocation9 + $0x1], 1 }

</bundles_post_ra>
